<compile_context>
chip_gen: v7x
topology: tpu7x:2x2x1
jax: 0.10.0
libtpu: 0.0.40
codegen_flags: <defaults>
</compile_context>

<pallas_src>
import functools

import jax
import jax.numpy as jnp
from jax.experimental import pallas as pl
from jax.experimental.pallas import tpu as pltpu

_LANE = 128      # TPU lane width (last-dim alignment target)
_SUBLANE = 8     # f32 sublane count (second-to-last-dim alignment target)


def _round_up(n, m):
    return ((n + m - 1) // m) * m


def _pad_cols(a, to):
    pad = to - a.shape[1]
    return a if pad == 0 else jnp.pad(a, ((0, 0), (0, pad)))


def _pad_rows(a, to):
    pad = to - a.shape[0]
    return a if pad == 0 else jnp.pad(a, ((0, pad), (0, 0)))


def _mlp_kernel(x_ref, w1_ref, b1_ref, w2_ref, b2_ref, w3_ref, b3_ref, out_ref):
    """Fused fc1+ReLU -> fc2+ReLU -> fc3 on one (tile_b, in_size) batch tile.

    Matmul operands use the weight dtype (f32 or bf16); accumulation is always
    f32 via preferred_element_type, and bias add / ReLU stay on the f32 VPU.
    """
    mm = w1_ref.dtype

    h1 = jnp.dot(x_ref[...].astype(mm), w1_ref[...],
                 preferred_element_type=jnp.float32) + b1_ref[...]
    h1 = jnp.maximum(h1, 0.0)                                   # (TB, 128) f32

    h2 = jnp.dot(h1.astype(mm), w2_ref[...],
                 preferred_element_type=jnp.float32) + b2_ref[...]
    h2 = jnp.maximum(h2, 0.0)                                   # (TB, 128) f32, cols 64.. are 0

    out = jnp.dot(h2.astype(mm), w3_ref[...],
                  preferred_element_type=jnp.float32) + b3_ref[...]
    out_ref[...] = out.astype(out_ref.dtype)                    # (TB, num_classes)


@functools.partial(jax.jit, static_argnames=("tb", "use_bf16"))
def diagnosis_forward(x, params, *, tb=2048, use_bf16=False):
    """Forward pass of DiagnosisModel.

    x: (B, input_size) f32 (or bf16).
    params: dict of w1,b1,w2,b2,w3,b3 with weights stored (in_features, out_features)
            and biases (1, out_features).
    tb: max batch tile (rows per grid step); the actual tile is a multiple of 8.
    use_bf16: cast x and the weights to bf16 at the HBM boundary; accum stays f32.
    """
    w1, b1 = params["w1"], params["b1"]
    w2, b2 = params["w2"], params["b2"]
    w3, b3 = params["w3"], params["b3"]

    B, in_size = x.shape
    num_classes = w3.shape[1]

    # ---- lane-align the hidden2 contraction dim (64 -> 128). Zero padding is
    # exact: ReLU(0)=0 and zero cols/rows contribute nothing to the matmuls.
    h2_pad = _round_up(w2.shape[1], _LANE)
    w2p = _pad_cols(w2, h2_pad)
    b2p = _pad_cols(b2, h2_pad)
    w3p = _pad_rows(w3, h2_pad)           # columns stay at num_classes (no padded writeback)

    if use_bf16:
        # Narrow matmul operands at the HBM boundary (halves x DMA bytes and the
        # resident weight footprint). Ideally the caller passes x already in bf16.
        x = x.astype(jnp.bfloat16)
        w1c, w2c, w3c = (w.astype(jnp.bfloat16) for w in (w1, w2p, w3p))
    else:
        w1c, w2c, w3c = w1, w2p, w3p

    # ---- batch tiling: tile is a multiple of 8; x is NOT padded, the ragged
    # final block is masked by Pallas (garbage rows are computed but never stored).
    tile_b = _round_up(min(tb, _round_up(B, _SUBLANE)), _SUBLANE)
    num_tiles = pl.cdiv(B, tile_b)
    if num_tiles > 1 and num_tiles % 2:
        # v7x: even tile count so both TensorCores get equal work; harmless on v5e/v6e.
        num_tiles += 1
        tile_b = _round_up(pl.cdiv(B, num_tiles), _SUBLANE)
        num_tiles = pl.cdiv(B, tile_b)
    grid = (num_tiles,)

    # Weights/biases: full-array blocks with a constant index_map -> resident in VMEM.
    resident = lambda a: pl.BlockSpec(a.shape, lambda i: (0, 0))

    return pl.pallas_call(
        _mlp_kernel,
        out_shape=jax.ShapeDtypeStruct((B, num_classes), jnp.float32),
        grid=grid,
        in_specs=[
            pl.BlockSpec((tile_b, in_size), lambda i: (i, 0)),   # x streamed per batch tile
            resident(w1c), resident(b1),
            resident(w2c), resident(b2p),
            resident(w3c), resident(b3),
        ],
        out_specs=pl.BlockSpec((tile_b, num_classes), lambda i: (i, 0)),
        compiler_params=pltpu.CompilerParams(
            dimension_semantics=("parallel",),   # batch tiles split across TCs (v7x)
        ),
    )(x, w1c, b1, w2c, b2p, w3c, b3)


def init_params(key, input_size, num_classes):
    """Deterministic synthetic init mirroring nn.Linear shapes (stored transposed)."""
    ks = jax.random.split(key, 6)

    def lin(kw, kb, fan_in, fan_out):
        bound = 1.0 / jnp.sqrt(fan_in)
        w = jax.random.uniform(kw, (fan_in, fan_out), jnp.float32, -bound, bound)
        b = jax.random.uniform(kb, (1, fan_out), jnp.float32, -bound, bound)
        return w, b

    w1, b1 = lin(ks[0], ks[1], input_size, 128)
    w2, b2 = lin(ks[2], ks[3], 128, 64)
    w3, b3 = lin(ks[4], ks[5], 64, num_classes)
    return {"w1": w1, "b1": b1, "w2": w2, "b2": b2, "w3": w3, "b3": b3}


def _reference(x, p):
    h = jnp.maximum(x @ p["w1"] + p["b1"], 0.0)
    h = jnp.maximum(h @ p["w2"] + p["b2"], 0.0)
    return h @ p["w3"] + p["b3"]


if __name__ == "__main__":
    # Small shapes implied by the module: input_size = len(all_symptoms),
    # num_classes = len(le.classes_); pick synthetic values.
    batch, input_size, num_classes = 2, 32, 8

    key = jax.random.PRNGKey(0)
    kx, kp = jax.random.split(key)
    x = jax.random.uniform(kx, (batch, input_size), jnp.float32)
    params = init_params(kp, input_size, num_classes)

    out = jax.block_until_ready(diagnosis_forward(x, params))   # f32 path, exact nn.Linear semantics
    ref = _reference(x, params)
    assert out.shape == (batch, num_classes)
    assert jnp.allclose(out, ref, atol=1e-5, rtol=1e-5)

    # Multi-tile path: non-multiple batch exercises the ragged final block and the
    # even-tile rebalancing (1031 rows, tb=512 -> 4 tiles of 264).
    big_B = 1031
    xb = jax.random.uniform(jax.random.PRNGKey(1), (big_B, input_size), jnp.float32)
    out_big = jax.block_until_ready(diagnosis_forward(xb, params, tb=512))
    ref_big = _reference(xb, params)
    assert out_big.shape == (big_B, num_classes)
    assert jnp.allclose(out_big, ref_big, atol=1e-5, rtol=1e-5)

    # bf16-at-the-HBM-boundary path (accumulation stays f32).
    out_bf16 = jax.block_until_ready(diagnosis_forward(xb, params, tb=512, use_bf16=True))
    assert jnp.allclose(out_bf16, ref_big, atol=5e-2, rtol=5e-2)  # bf16 operand tolerance

    print("KERNEL_OK")
</pallas_src>

<mosaic_0001>
module attributes {stable_mosaic.version = 11 : i64} {
  func.func @_mlp_kernel(%arg0: i32, %arg1: memref<8x32xf32, #tpu.memory_space<vmem>>, %arg2: memref<32x128xf32, #tpu.memory_space<vmem>>, %arg3: memref<1x128xf32, #tpu.memory_space<vmem>>, %arg4: memref<128x128xf32, #tpu.memory_space<vmem>>, %arg5: memref<1x128xf32, #tpu.memory_space<vmem>>, %arg6: memref<128x8xf32, #tpu.memory_space<vmem>>, %arg7: memref<1x8xf32, #tpu.memory_space<vmem>>, %arg8: memref<8x8xf32, #tpu.memory_space<vmem>>) attributes {dimension_semantics = [#tpu.dimension_semantics<parallel>], iteration_bounds = array<i64: 1>, scalar_prefetch = 0 : i64, scratch_operands = 0 : i64, tpu.core_type = #tpu.core_type<tc>, window_params = [{transform_indices = @transform_0, window_bounds = array<i64: 8, 32>}, {pipeline_mode = #tpu.pipeline_mode<synchronous>, transform_indices = @transform_1, window_bounds = array<i64: 32, 128>}, {pipeline_mode = #tpu.pipeline_mode<synchronous>, transform_indices = @transform_2, window_bounds = array<i64: 1, 128>}, {pipeline_mode = #tpu.pipeline_mode<synchronous>, transform_indices = @transform_3, window_bounds = array<i64: 128, 128>}, {pipeline_mode = #tpu.pipeline_mode<synchronous>, transform_indices = @transform_4, window_bounds = array<i64: 1, 128>}, {pipeline_mode = #tpu.pipeline_mode<synchronous>, transform_indices = @transform_5, window_bounds = array<i64: 128, 8>}, {pipeline_mode = #tpu.pipeline_mode<synchronous>, transform_indices = @transform_6, window_bounds = array<i64: 1, 8>}, {transform_indices = @transform_7, window_bounds = array<i64: 8, 8>}]} {
    %c0 = arith.constant 0 : index
    %c0_0 = arith.constant 0 : index
    %0 = vector.load %arg1[%c0, %c0_0] : memref<8x32xf32, #tpu.memory_space<vmem>>, vector<8x32xf32>
    %c0_1 = arith.constant 0 : index
    %c0_2 = arith.constant 0 : index
    %1 = vector.load %arg2[%c0_1, %c0_2] : memref<32x128xf32, #tpu.memory_space<vmem>>, vector<32x128xf32>
    %cst = arith.constant dense<0.000000e+00> : vector<8x128xf32>
    %2 = tpu.matmul %0, %1, %cst {dimension_numbers = #tpu.dot_dimension_numbers<[1], [0], [0], [1], [0, 0, 1, 1], [], []>} : vector<8x32xf32>, vector<32x128xf32>, vector<8x128xf32> -> vector<8x128xf32>
    %c0_3 = arith.constant 0 : index
    %c0_4 = arith.constant 0 : index
    %3 = vector.load %arg3[%c0_3, %c0_4] : memref<1x128xf32, #tpu.memory_space<vmem>>, vector<1x128xf32>
    %4 = vector.broadcast %3 : vector<1x128xf32> to vector<8x128xf32>
    %5 = arith.addf %2, %4 : vector<8x128xf32>
    %cst_5 = arith.constant 0.000000e+00 : f32
    %6 = vector.broadcast %cst_5 : f32 to vector<8x128xf32>
    %7 = arith.maximumf %5, %6 : vector<8x128xf32>
    %c0_6 = arith.constant 0 : index
    %c0_7 = arith.constant 0 : index
    %8 = vector.load %arg4[%c0_6, %c0_7] : memref<128x128xf32, #tpu.memory_space<vmem>>, vector<128x128xf32>
    %cst_8 = arith.constant dense<0.000000e+00> : vector<8x128xf32>
    %9 = tpu.matmul %7, %8, %cst_8 {dimension_numbers = #tpu.dot_dimension_numbers<[1], [0], [0], [1], [0, 0, 1, 1], [], []>} : vector<8x128xf32>, vector<128x128xf32>, vector<8x128xf32> -> vector<8x128xf32>
    %c0_9 = arith.constant 0 : index
    %c0_10 = arith.constant 0 : index
    %10 = vector.load %arg5[%c0_9, %c0_10] : memref<1x128xf32, #tpu.memory_space<vmem>>, vector<1x128xf32>
    %11 = vector.broadcast %10 : vector<1x128xf32> to vector<8x128xf32>
    %12 = arith.addf %9, %11 : vector<8x128xf32>
    %cst_11 = arith.constant 0.000000e+00 : f32
    %13 = vector.broadcast %cst_11 : f32 to vector<8x128xf32>
    %14 = arith.maximumf %12, %13 : vector<8x128xf32>
    %c0_12 = arith.constant 0 : index
    %c0_13 = arith.constant 0 : index
    %15 = vector.load %arg6[%c0_12, %c0_13] : memref<128x8xf32, #tpu.memory_space<vmem>>, vector<128x8xf32>
    %cst_14 = arith.constant dense<0.000000e+00> : vector<8x8xf32>
    %16 = tpu.matmul %14, %15, %cst_14 {dimension_numbers = #tpu.dot_dimension_numbers<[1], [0], [0], [1], [0, 0, 1, 1], [], []>} : vector<8x128xf32>, vector<128x8xf32>, vector<8x8xf32> -> vector<8x8xf32>
    %c0_15 = arith.constant 0 : index
    %c0_16 = arith.constant 0 : index
    %17 = vector.load %arg7[%c0_15, %c0_16] : memref<1x8xf32, #tpu.memory_space<vmem>>, vector<1x8xf32>
    %18 = vector.broadcast %17 : vector<1x8xf32> to vector<8x8xf32>
    %19 = arith.addf %16, %18 : vector<8x8xf32>
    %c0_17 = arith.constant 0 : index
    %c0_18 = arith.constant 0 : index
    %20 = vector.load %arg8[%c0_17, %c0_18] : memref<8x8xf32, #tpu.memory_space<vmem>>, vector<8x8xf32>
    tpu.vector_store %arg8[%c0_17, %c0_18], %19 {strides = array<i32>} : memref<8x8xf32, #tpu.memory_space<vmem>>, vector<8x8xf32>,
    return
  }
  func.func @transform_0(%arg0: i32) -> (i32, i32) {
    %c0_i32 = arith.constant 0 : i32
    %c0_i32_0 = arith.constant 0 : i32
    return %arg0, %c0_i32 : i32, i32
  }
  func.func @transform_1(%arg0: i32) -> (i32, i32) {
    %c0_i32 = arith.constant 0 : i32
    %c0_i32_0 = arith.constant 0 : i32
    %c0_i32_1 = arith.constant 0 : i32
    return %c0_i32, %c0_i32_0 : i32, i32
  }
  func.func @transform_2(%arg0: i32) -> (i32, i32) {
    %c0_i32 = arith.constant 0 : i32
    %c0_i32_0 = arith.constant 0 : i32
    %c0_i32_1 = arith.constant 0 : i32
    return %c0_i32, %c0_i32_0 : i32, i32
  }
  func.func @transform_3(%arg0: i32) -> (i32, i32) {
    %c0_i32 = arith.constant 0 : i32
    %c0_i32_0 = arith.constant 0 : i32
    %c0_i32_1 = arith.constant 0 : i32
    return %c0_i32, %c0_i32_0 : i32, i32
  }
  func.func @transform_4(%arg0: i32) -> (i32, i32) {
    %c0_i32 = arith.constant 0 : i32
    %c0_i32_0 = arith.constant 0 : i32
    %c0_i32_1 = arith.constant 0 : i32
    return %c0_i32, %c0_i32_0 : i32, i32
  }
  func.func @transform_5(%arg0: i32) -> (i32, i32) {
    %c0_i32 = arith.constant 0 : i32
    %c0_i32_0 = arith.constant 0 : i32
    %c0_i32_1 = arith.constant 0 : i32
    return %c0_i32, %c0_i32_0 : i32, i32
  }
  func.func @transform_6(%arg0: i32) -> (i32, i32) {
    %c0_i32 = arith.constant 0 : i32
    %c0_i32_0 = arith.constant 0 : i32
    %c0_i32_1 = arith.constant 0 : i32
    return %c0_i32, %c0_i32_0 : i32, i32
  }
  func.func @transform_7(%arg0: i32) -> (i32, i32) {
    %c0_i32 = arith.constant 0 : i32
    %c0_i32_0 = arith.constant 0 : i32
    return %arg0, %c0_i32 : i32, i32
  }
}

</mosaic_0001>

<bundles_post_ra>
// kernel: diagnosis_forward.1
= control target key start
LH: loop header
LB: loop body
LE: loop exit
PB: predicated region body
PF: predicated region fallthrough
CT: control target
= control target key end

     0   :  { %12 = vsyncpa [#allocation3], 0  ;;  %v527_v2 = vmov 0.0|0.0   ;;  %vm528_vm0 = vmmov 0   ;;  %v529_v6 = vmov 0.0   ;;  %vm39_vm1 = vcmask 261120   ;;  %s726_s0 = inlined_call_operand.vmem [shape: f32[2,32], index: 0, kind: input, shape index: {}]   ;;  %s727_s1 = inlined_call_operand.vmem [shape: f32[32,128], index: 1, kind: input, shape index: {}]   ;;  %s728_s2 = inlined_call_operand.vmem [shape: f32[1,128], index: 2, kind: input, shape index: {}]   ;;  %s729_s3 = inlined_call_operand.vmem [shape: f32[128,128], index: 3, kind: input, shape index: {}]   ;;  %s730_s4 = inlined_call_operand.vmem [shape: f32[1,128], index: 4, kind: input, shape index: {}]   ;;  %s731_s5 = inlined_call_operand.vmem [shape: f32[128,8], index: 5, kind: input, shape index: {}]   ;;  %s732_s6 = inlined_call_operand.vmem [shape: f32[1,8], index: 6, kind: input, shape index: {}]   ;;  %s733_s7 = inlined_call_operand.hbm [shape: f32[2,8], index: 7, kind: output, shape index: {}]  }
   0x1   :  { %v28_v0 = vld [vmem:[%s727_s1] sm:$0xff]  ;;  %v29_v1 = vld [vmem:[%s727_s1 + $0x8] sm:$0xff]  ;;  %443 = vmatprep.subr.bf16.mxu0 %v527_v2  ;;  %v30_v4 = vld [vmem:[%s727_s1 + $0x10] sm:$0xff]  ;;  %449 = vmatprep.subr.bf16.mxu1 %v527_v2  ;;  %vm301_vm2 = vcmask 64512  }
   0x2   :  { %v444_v3 = vpack.c.bf16 %v29_v1, %v28_v0  ;;  %v31_v5 = vld [vmem:[%s727_s1 + $0x18] sm:$0xff]  ;;  %370 = vmatprep.mubr.msk.f32.mxu0 %vm528_vm0, %v529_v6  ;;  %v114_v7 = vld [vmem:[%s729_s3] sm:$0xff]  ;;  %v115_v8 = vld [vmem:[%s729_s3 + $0x8] sm:$0xff]  ;;  %405 = vmatprep.mubr.msk.f32.mxu1 %vm528_vm0, %v529_v6 }
   0x3   :  { %v116_v9 = vld [vmem:[%s729_s3 + $0x10] sm:$0xff]  ;;  %v447_v10 = vpack.c.bf16 %v31_v5, %v30_v4  ;;  %v450_v11 = vpack.c.bf16 %v115_v8, %v114_v7  ;;  %v117_v12 = vld [vmem:[%s729_s3 + $0x18] sm:$0xff]  ;;  %v118_v14 = vld [vmem:[%s729_s3 + $0x20] sm:$0xff] }
   0x4   :  { %445 = vmatpush3.bf16.msra.mxu0 %v444_v3  ;;  %v453_v13 = vpack.c.bf16 %v117_v12, %v116_v9  ;;  %v119_v15 = vld [vmem:[%s729_s3 + $0x28] sm:$0xff]  ;;  %v27_v16 = vld [vmem:[%s726_s0] sm:$0xff]  ;;  %v120_v18 = vld [vmem:[%s729_s3 + $0x30] sm:$0xff] }
   0x5   :  { %446 = vmatprep.subr.bf16.mxu0 %v527_v2  ;;  %451 = vmatpush3.bf16.msra.mxu1 %v450_v11  ;;  %v456_v17 = vpack.c.bf16 %v119_v15, %v118_v14  ;;  %v121_v19 = vld [vmem:[%s729_s3 + $0x38] sm:$0xff]  ;;  %v122_v21 = vld [vmem:[%s729_s3 + $0x40] sm:$0xff]  ;;  %v123_v22 = vld [vmem:[%s729_s3 + $0x48] sm:$0xff] }
   0x6   :  { %452 = vmatprep.subr.bf16.mxu1 %v527_v2  ;;  %v459_v20 = vpack.c.bf16 %v121_v19, %v120_v18  ;;  %v462_v23 = vpack.c.bf16 %v123_v22, %v122_v21  ;;  %v124_v24 = vld [vmem:[%s729_s3 + $0x50] sm:$0xff]  ;;  %v125_v25 = vld [vmem:[%s729_s3 + $0x58] sm:$0xff]  ;;  %v126_v27 = vld [vmem:[%s729_s3 + $0x60] sm:$0xff] }
   0x7   :  { %v465_v26 = vpack.c.bf16 %v125_v25, %v124_v24  ;;  %v127_v28 = vld [vmem:[%s729_s3 + $0x68] sm:$0xff]  ;;  %v128_v30 = vld [vmem:[%s729_s3 + $0x70] sm:$0xff]  ;;  %v129_v31 = vld [vmem:[%s729_s3 + $0x78] sm:$0xff] }
   0x8   :  { %448 = vmatpush3.bf16.msra.mxu0 %v447_v10  ;;  %v468_v29 = vpack.c.bf16 %v127_v28, %v126_v27  ;;  %v471_v32 = vpack.c.bf16 %v129_v31, %v128_v30  ;;  %v208_v33 = vld [vmem:[%s731_s5] sm:$0xff]  ;;  %v209_v34 = vld [vmem:[%s731_s5 + $0x8] sm:$0xff]  ;;  %v210_v35 = vld [vmem:[%s731_s5 + $0x10] sm:$0xff] }
   0x9   :  { %473 = vmatprep.subr.bf16.mxu0 %v527_v2  ;;  %454 = vmatpush3.bf16.msra.mxu1 %v453_v13  ;;  %v474_v36 = vpack.c.bf16 %v209_v34, %v208_v33  ;;  %v211_v37 = vld [vmem:[%s731_s5 + $0x18] sm:$0xff]  ;;  %v212_v39 = vld [vmem:[%s731_s5 + $0x20] sm:$0xff]  ;;  %v213_v40 = vld [vmem:[%s731_s5 + $0x28] sm:$0xff] }
   0xa   :  { %455 = vmatprep.subr.bf16.mxu1 %v527_v2  ;;  %v477_v38 = vpack.c.bf16 %v211_v37, %v210_v35  ;;  %v480_v41 = vpack.c.bf16 %v213_v40, %v212_v39  ;;  %v214_v42 = vld [vmem:[%s731_s5 + $0x30] sm:$0xff]  ;;  %v215_v43 = vld [vmem:[%s731_s5 + $0x38] sm:$0xff]  ;;  %v216_v45 = vld [vmem:[%s731_s5 + $0x40] sm:$0xff] }
   0xb   :  { %371 = vmatmul.mubr.msk.f32.vlgmr.msra.gmra.mrb[0].mxu0 %vm39_vm1, %v27_v16  ;;  %v483_v44 = vpack.c.bf16 %v215_v43, %v214_v42  ;;  %v217_v46 = vld [vmem:[%s731_s5 + $0x48] sm:$0xff]  ;;  %v218_v48 = vld [vmem:[%s731_s5 + $0x50] sm:$0xff]  ;;  %v219_v49 = vld [vmem:[%s731_s5 + $0x58] sm:$0xff] }
   0xc   :  { %440 = vmatprep.mubr.msk.f32.mxu0 %vm528_vm0, %v529_v6  ;;  %475 = vmatpush3.bf16.msra.mxu0 %v474_v36  ;;  %v486_v47 = vpack.c.bf16 %v217_v46, %v216_v45  ;;  %v489_v50 = vpack.c.bf16 %v219_v49, %v218_v48  ;;  %v220_v51 = vld [vmem:[%s731_s5 + $0x60] sm:$0xff]  ;;  %v221_v52 = vld [vmem:[%s731_s5 + $0x68] sm:$0xff]  ;;  %v222_v59 = vld [vmem:[%s731_s5 + $0x70] sm:$0xff] }
   0xd   :  { %457 = vmatpush3.bf16.msra.mxu1 %v456_v17  ;;  %476 = vmatprep.subr.bf16.mxu0 %v527_v2  ;;  %v492_v53 = vpack.c.bf16 %v221_v52, %v220_v51  ;;  %v319_v54 = vld [vmem:[%s728_s2] ss:$0 sm:$0xff]  ;;  %v223_v60 = vld [vmem:[%s731_s5 + $0x78] sm:$0xff] }
   0xe   :  { %458 = vmatprep.subr.bf16.mxu1 %v527_v2  ;;  %v495_v61 = vpack.c.bf16 %v223_v60, %v222_v59  ;;  %v321_v62 = vld [vmem:[%s730_s4] ss:$0 sm:$0xff] }
   0xf   :  { %v322_v3 = vld [vmem:[%s732_s6] ss:$0 sm:$0xff] }
  0x10   :  { %478 = vmatpush3.bf16.msra.mxu0 %v477_v38 }
  0x11   :  { %460 = vmatpush3.bf16.msra.mxu1 %v459_v20  ;;  %479 = vmatprep.subr.bf16.mxu0 %v527_v2 }
  0x12   :  { %461 = vmatprep.subr.bf16.mxu1 %v527_v2 }
  0x14   :  { %481 = vmatpush3.bf16.msra.mxu0 %v480_v41 }
  0x15   :  { %463 = vmatpush3.bf16.msra.mxu1 %v462_v23  ;;  %482 = vmatprep.subr.bf16.mxu0 %v527_v2 }
  0x16   :  { %464 = vmatprep.subr.bf16.mxu1 %v527_v2 }
  0x18   :  { %484 = vmatpush3.bf16.msra.mxu0 %v483_v44 }
  0x19   :  { %466 = vmatpush3.bf16.msra.mxu1 %v465_v26  ;;  %485 = vmatprep.subr.bf16.mxu0 %v527_v2 }
  0x1a   :  { %467 = vmatprep.subr.bf16.mxu1 %v527_v2 }
  0x1c   :  { %487 = vmatpush3.bf16.msra.mxu0 %v486_v47 }
  0x1d   :  { %469 = vmatpush3.bf16.msra.mxu1 %v468_v29  ;;  %488 = vmatprep.subr.bf16.mxu0 %v527_v2 }
  0x1e   :  { %470 = vmatprep.subr.bf16.mxu1 %v527_v2 }
  0x20   :  { %490 = vmatpush3.bf16.msra.mxu0 %v489_v50 }
  0x21   :  { %472 = vmatpush3.bf16.msra.mxu1 %v471_v32  ;;  %491 = vmatprep.subr.bf16.mxu0 %v527_v2 }
  0x24   :  { %493 = vmatpush3.bf16.msra.mxu0 %v492_v53 }
  0x25   :  { %494 = vmatprep.subr.bf16.mxu0 %v527_v2 }
  0x28   :  { %496 = vmatpush3.bf16.msra.mxu0 %v495_v61 }
  0xde   :  { %v109_v55 = vpop.f32.mrb[0].mxu0 }
  0xdf   :  { %v110_v56 = vadd.f32 %v319_v54, %v109_v55  ;;  %v372_v57 = vpop.f32.mrb[1].mxu0 }
  0xe1   :  { %v113_v58 = vmax.f32 %v110_v56, 0.0 }
  0xe3   :  { %406 = vmatmul.mubr.f32.vlgmr.msra.gmra.mrb[0].mxu1 %v113_v58 }
 0x1b6   :  { %v203_v63 = vpop.f32.mrb[0].mxu1 }
 0x1b7   :  { %v204_v0 = vadd.f32 %v321_v62, %v203_v63  ;;  %v407_v1 = vpop.f32.mrb[1].mxu1 }
 0x1b9   :  { %v207_v2 = vmax.f32 %v204_v0, 0.0 }
 0x1bb   :  { %441 = vmatmul.mubr.f32.vlgmr.msra.gmra.mrb[2].mxu0 %v207_v2 }
 0x28e   :  { %v297_v4 = vpop.f32.mrb[2].mxu0 }
 0x28f   :  { %v298_v5 = vadd.f32 %v322_v3, %v297_v4  ;;  %v442_v6 = vpop.f32.mrb[3].mxu0 }
 0x291   :  { %302 = vst.msk [vmem:[#allocation2] sm:$0xff] %vm301_vm2, %v298_v5 }
 0x292   :  { %307 = vsyncadd [#allocation3], 96  ;;  %s530_s5 = smov [#allocation2]  }
 0x293   :  { %s308_s26 = sshll.u32 %s530_s5, 4  ;;  %s309_s26 = int_to_ptr.vmem [resolvable:$true] %s308_s26 }
 0x294   :  { %s503_s27 = scalar_lea.vmem %s309_s26, 32  ;;  %s507_s4 = scalar_lea.vmem %s309_s26, 128 }
 0x295   :  { %p504_p0 = scmp.ne.s32.totalorder %s309_s26, %s503_s27  ;;  %p508_p1 = scmp.lt.s32.totalorder %s309_s26, %s309_s26 }
 0x296   :  { %p509_p2 = scmp.lt.s32.totalorder %s507_s4, %s503_s27 }
 0x298   :  { %p510_p3 = por %p509_p2, %p508_p1 }
 0x29a   :  { %p511_p4 = pnand %p510_p3, %p504_p0 }
 0x29c   :  { %514 = shalt.err (!%p511_p4)
}
 0x29d   :  { %s515_s6 = scalar_lea.hbm %s733_s7, 32 }
 0x29e   :  { %p516_p5 = scmp.ne.s32.totalorder %s733_s7, %s515_s6  ;;  %p519_p6 = scmp.lt.u32.totalorder %s515_s6, %s733_s7 }
 0x2a0   :  { %p521_p7 = pnand %p519_p6, %p516_p5 }
 0x2a2   :  { %524 = shalt.err (!%p521_p7)
}
 0x2a3   :  { %s531_s11 = smov 32   ;;  %s532_s12 = smov 2  }
 0x2a4   :  { %314 = dma.vmem_to_hbm [thread:$0]  %s309_s26, 32, %s733_s7, [#allocation3], %s531_s11, %s531_s11, %s532_s12  }
 0x2a5   :  { %525 = dma.done.wait [#allocation3], 128  }
 0x2a6   :  { %526 = vsyncadd [#allocation3], 4294967168 }
 0x2a7   :  { %318 = vsyncpa [#allocation3], 1 }

</bundles_post_ra>
